<compile_context>
chip_gen: v5e
topology: v5e:2x2
jax: 0.10.0
libtpu: 0.0.40
codegen_flags: <defaults>
</compile_context>

<pallas_src>
import jax
import jax.numpy as jnp
from jax.experimental import pallas as pl
from jax.experimental.pallas import tpu as pltpu


def _prelu(v, alpha):
    # PReLU(x) = max(0, x) + alpha * min(0, x)
    return jnp.where(v > 0, v, alpha * v)


def tied_ae_kernel(x_ref, w1_ref, b1_ref, w2_ref, b2_ref,
                   biasxx_ref, biasin_ref, a1_ref, a2_ref,
                   enc_ref, rec_ref):
    x = x_ref[...]              # (TB, inp)
    w1 = w1_ref[...]            # (xx, inp)   encoder.weight
    w2 = w2_ref[...]            # (out, xx)   encoder2.weight
    a1 = a1_ref[0]              # scalar PReLU slopes (SMEM)
    a2 = a2_ref[0]

    # h = PReLU_1(x @ W1^T + b1): transpose folded into the contraction dims.
    h = jax.lax.dot_general(x, w1, (((1,), (1,)), ((), ())),
                            preferred_element_type=jnp.float32)
    h = _prelu(h + b1_ref[...], a1)                          # (TB, xx)

    # enc = h @ W2^T + b2
    enc = jax.lax.dot_general(h.astype(w2.dtype), w2, (((1,), (1,)), ((), ())),
                              preferred_element_type=jnp.float32) + b2_ref[...]

    # Tied decoder stage 1: r = PReLU_2(enc @ W2 + biasxx)
    r = jax.lax.dot_general(enc.astype(w2.dtype), w2, (((1,), (0,)), ((), ())),
                            preferred_element_type=jnp.float32)
    r = _prelu(r + biasxx_ref[...], a2)                      # (TB, xx)

    # Tied decoder stage 2: rec = r @ W1 + bias
    rec = jax.lax.dot_general(r.astype(w1.dtype), w1, (((1,), (0,)), ((), ())),
                              preferred_element_type=jnp.float32) + biasin_ref[...]

    # Stores last so the enc store does not gate the decoder matmul pushes.
    enc_ref[...] = enc.astype(enc_ref.dtype)
    rec_ref[...] = rec.astype(rec_ref.dtype)


def tied_multi_autoencoder_forward(x, w1, b1, w2, b2, biasxx, bias_in, a1, a2,
                                   *, tb=128):
    """x:(B,inp)  w1:(xx,inp) b1:(xx,)  w2:(out,xx) b2:(out,)  biasxx:(xx,) bias_in:(inp,)
    a1,a2: scalar PReLU slopes.  Returns (encoded:(B,out), reconstructed:(B,inp))."""
    B, inp = x.shape
    xx = w1.shape[0]
    out = w2.shape[0]
    tb = min(tb, B)
    grid = (pl.cdiv(B, tb),)

    # Biases as (1, N) rows (VMEM-resident, broadcast across the batch tile).
    b1_2d = b1.reshape(1, xx)
    b2_2d = b2.reshape(1, out)
    biasxx_2d = biasxx.reshape(1, xx)
    biasin_2d = bias_in.reshape(1, inp)
    a1 = jnp.asarray(a1, jnp.float32).reshape(1)
    a2 = jnp.asarray(a2, jnp.float32).reshape(1)

    def resident(shape):
        # Whole-array block, same block index every grid step -> stays in VMEM.
        return pl.BlockSpec(shape, lambda i: (0,) * len(shape))

    smem_scalar = pl.BlockSpec(memory_space=pltpu.MemorySpace.SMEM)

    return pl.pallas_call(
        tied_ae_kernel,
        out_shape=(jax.ShapeDtypeStruct((B, out), x.dtype),
                   jax.ShapeDtypeStruct((B, inp), x.dtype)),
        grid=grid,
        in_specs=[
            pl.BlockSpec((tb, inp), lambda i: (i, 0)),   # x, tiled over batch
            resident((xx, inp)),                         # W1 (resident)
            resident((1, xx)),                           # b1
            resident((out, xx)),                         # W2 (resident)
            resident((1, out)),                          # b2
            resident((1, xx)),                           # biasxx
            resident((1, inp)),                          # bias
            smem_scalar,                                 # PReLU_1 slope
            smem_scalar,                                 # PReLU_2 slope
        ],
        out_specs=(
            pl.BlockSpec((tb, out), lambda i: (i, 0)),   # encoded_feats
            pl.BlockSpec((tb, inp), lambda i: (i, 0)),   # reconstructed_output
        ),
        compiler_params=pltpu.CompilerParams(
            dimension_semantics=("parallel",)),
    )(x, w1, b1_2d, w2, b2_2d, biasxx_2d, biasin_2d, a1, a2)


def _init_linear(kw, kb, out_features, in_features):
    # Mimics nn.Linear's uniform(-1/sqrt(in), 1/sqrt(in)) init, deterministically.
    bound = 1.0 / jnp.sqrt(jnp.float32(in_features))
    w = jax.random.uniform(kw, (out_features, in_features), jnp.float32,
                           minval=-bound, maxval=bound)
    b = jax.random.uniform(kb, (out_features,), jnp.float32,
                           minval=-bound, maxval=bound)
    return w, b


if __name__ == "__main__":
    key = jax.random.PRNGKey(0)
    ks = jax.random.split(key, 7)

    # Lane-dense feature dims (multiples of 128) and a batch big enough to tile.
    B, INP, XX, OUT = 256, 256, 128, 128

    x = jax.random.normal(ks[0], (B, INP), jnp.float32)
    w1, b1 = _init_linear(ks[1], ks[2], XX, INP)      # encoder : Linear(INP -> XX)
    w2, b2 = _init_linear(ks[3], ks[4], OUT, XX)      # encoder2: Linear(XX -> OUT)
    biasxx = jax.random.uniform(ks[5], (XX,), jnp.float32) * 0.001
    bias_in = jax.random.uniform(ks[6], (INP,), jnp.float32) * 0.001
    a1 = jnp.float32(0.25)                            # nn.PReLU() default slope
    a2 = jnp.float32(0.25)

    fwd = jax.jit(tied_multi_autoencoder_forward)
    enc, rec = fwd(x, w1, b1, w2, b2, biasxx, bias_in, a1, a2)
    jax.block_until_ready((enc, rec))

    # Pure-JAX reference of the PyTorch forward.
    def prelu(v, a):
        return jnp.where(v > 0, v, a * v)

    h_ref = prelu(x @ w1.T + b1, a1)
    enc_ref = h_ref @ w2.T + b2
    r_ref = prelu(enc_ref @ w2 + biasxx, a2)
    rec_ref = r_ref @ w1 + bias_in

    assert enc.shape == (B, OUT) and rec.shape == (B, INP)
    assert jnp.allclose(enc, enc_ref, atol=1e-3, rtol=1e-3), "encoded_feats mismatch"
    assert jnp.allclose(rec, rec_ref, atol=1e-3, rtol=1e-3), "reconstructed_output mismatch"

    print("KERNEL_OK")
</pallas_src>

<mosaic_0001>
module attributes {stable_mosaic.version = 11 : i64} {
  func.func @tied_ae_kernel(%arg0: i32, %arg1: memref<128x256xf32, #tpu.memory_space<vmem>>, %arg2: memref<128x256xf32, #tpu.memory_space<vmem>>, %arg3: memref<1x128xf32, #tpu.memory_space<vmem>>, %arg4: memref<128x128xf32, #tpu.memory_space<vmem>>, %arg5: memref<1x128xf32, #tpu.memory_space<vmem>>, %arg6: memref<1x128xf32, #tpu.memory_space<vmem>>, %arg7: memref<1x256xf32, #tpu.memory_space<vmem>>, %arg8: memref<1xf32, #tpu.memory_space<smem>>, %arg9: memref<1xf32, #tpu.memory_space<smem>>, %arg10: memref<128x128xf32, #tpu.memory_space<vmem>>, %arg11: memref<128x256xf32, #tpu.memory_space<vmem>>) attributes {dimension_semantics = [#tpu.dimension_semantics<parallel>], iteration_bounds = array<i64: 2>, scalar_prefetch = 0 : i64, scratch_operands = 0 : i64, tpu.core_type = #tpu.core_type<tc>, window_params = [{transform_indices = @transform_0, window_bounds = array<i64: 128, 256>}, {pipeline_mode = #tpu.pipeline_mode<synchronous>, transform_indices = @transform_1, window_bounds = array<i64: 128, 256>}, {pipeline_mode = #tpu.pipeline_mode<synchronous>, transform_indices = @transform_2, window_bounds = array<i64: 1, 128>}, {pipeline_mode = #tpu.pipeline_mode<synchronous>, transform_indices = @transform_3, window_bounds = array<i64: 128, 128>}, {pipeline_mode = #tpu.pipeline_mode<synchronous>, transform_indices = @transform_4, window_bounds = array<i64: 1, 128>}, {pipeline_mode = #tpu.pipeline_mode<synchronous>, transform_indices = @transform_5, window_bounds = array<i64: 1, 128>}, {pipeline_mode = #tpu.pipeline_mode<synchronous>, transform_indices = @transform_6, window_bounds = array<i64: 1, 256>}, {transform_indices = @transform_7, window_bounds = array<i64: 1>}, {transform_indices = @transform_8, window_bounds = array<i64: 1>}, {transform_indices = @transform_9, window_bounds = array<i64: 128, 128>}, {transform_indices = @transform_10, window_bounds = array<i64: 128, 256>}]} {
    %c0 = arith.constant 0 : index
    %c0_0 = arith.constant 0 : index
    %0 = vector.load %arg1[%c0, %c0_0] : memref<128x256xf32, #tpu.memory_space<vmem>>, vector<128x256xf32>
    %c0_1 = arith.constant 0 : index
    %c0_2 = arith.constant 0 : index
    %1 = vector.load %arg2[%c0_1, %c0_2] : memref<128x256xf32, #tpu.memory_space<vmem>>, vector<128x256xf32>
    %c0_3 = arith.constant 0 : index
    %c0_4 = arith.constant 0 : index
    %2 = vector.load %arg4[%c0_3, %c0_4] : memref<128x128xf32, #tpu.memory_space<vmem>>, vector<128x128xf32>
    %c0_5 = arith.constant 0 : index
    %3 = memref.load %arg8[%c0_5] : memref<1xf32, #tpu.memory_space<smem>>
    %c0_6 = arith.constant 0 : index
    %4 = memref.load %arg9[%c0_6] : memref<1xf32, #tpu.memory_space<smem>>
    %cst = arith.constant dense<0.000000e+00> : vector<128x128xf32>
    %5 = tpu.matmul %0, %1, %cst {dimension_numbers = #tpu.dot_dimension_numbers<[1], [1], [0], [0], [0, 0, 1, 0], [], []>} : vector<128x256xf32>, vector<128x256xf32>, vector<128x128xf32> -> vector<128x128xf32>
    %c0_7 = arith.constant 0 : index
    %c0_8 = arith.constant 0 : index
    %6 = vector.load %arg3[%c0_7, %c0_8] : memref<1x128xf32, #tpu.memory_space<vmem>>, vector<1x128xf32>
    %7 = vector.broadcast %6 : vector<1x128xf32> to vector<128x128xf32>
    %8 = arith.addf %5, %7 : vector<128x128xf32>
    %cst_9 = arith.constant 0.000000e+00 : f32
    %9 = vector.broadcast %cst_9 : f32 to vector<128x128xf32>
    %10 = arith.cmpf ogt, %8, %9 : vector<128x128xf32>
    %11 = vector.broadcast %3 : f32 to vector<128x128xf32>
    %12 = arith.mulf %11, %8 : vector<128x128xf32>
    %13 = arith.select %10, %8, %12 : vector<128x128xi1>, vector<128x128xf32>
    %cst_10 = arith.constant dense<0.000000e+00> : vector<128x128xf32>
    %14 = tpu.matmul %13, %2, %cst_10 {dimension_numbers = #tpu.dot_dimension_numbers<[1], [1], [0], [0], [0, 0, 1, 0], [], []>} : vector<128x128xf32>, vector<128x128xf32>, vector<128x128xf32> -> vector<128x128xf32>
    %c0_11 = arith.constant 0 : index
    %c0_12 = arith.constant 0 : index
    %15 = vector.load %arg5[%c0_11, %c0_12] : memref<1x128xf32, #tpu.memory_space<vmem>>, vector<1x128xf32>
    %16 = vector.broadcast %15 : vector<1x128xf32> to vector<128x128xf32>
    %17 = arith.addf %14, %16 : vector<128x128xf32>
    %cst_13 = arith.constant dense<0.000000e+00> : vector<128x128xf32>
    %18 = tpu.matmul %17, %2, %cst_13 {dimension_numbers = #tpu.dot_dimension_numbers<[1], [0], [0], [1], [0, 0, 1, 1], [], []>} : vector<128x128xf32>, vector<128x128xf32>, vector<128x128xf32> -> vector<128x128xf32>
    %c0_14 = arith.constant 0 : index
    %c0_15 = arith.constant 0 : index
    %19 = vector.load %arg6[%c0_14, %c0_15] : memref<1x128xf32, #tpu.memory_space<vmem>>, vector<1x128xf32>
    %20 = vector.broadcast %19 : vector<1x128xf32> to vector<128x128xf32>
    %21 = arith.addf %18, %20 : vector<128x128xf32>
    %cst_16 = arith.constant 0.000000e+00 : f32
    %22 = vector.broadcast %cst_16 : f32 to vector<128x128xf32>
    %23 = arith.cmpf ogt, %21, %22 : vector<128x128xf32>
    %24 = vector.broadcast %4 : f32 to vector<128x128xf32>
    %25 = arith.mulf %24, %21 : vector<128x128xf32>
    %26 = arith.select %23, %21, %25 : vector<128x128xi1>, vector<128x128xf32>
    %cst_17 = arith.constant dense<0.000000e+00> : vector<128x256xf32>
    %27 = tpu.matmul %26, %1, %cst_17 {dimension_numbers = #tpu.dot_dimension_numbers<[1], [0], [0], [1], [0, 0, 1, 1], [], []>} : vector<128x128xf32>, vector<128x256xf32>, vector<128x256xf32> -> vector<128x256xf32>
    %c0_18 = arith.constant 0 : index
    %c0_19 = arith.constant 0 : index
    %28 = vector.load %arg7[%c0_18, %c0_19] : memref<1x256xf32, #tpu.memory_space<vmem>>, vector<1x256xf32>
    %29 = vector.broadcast %28 : vector<1x256xf32> to vector<128x256xf32>
    %30 = arith.addf %27, %29 : vector<128x256xf32>
    %c0_20 = arith.constant 0 : index
    %c0_21 = arith.constant 0 : index
    %31 = vector.load %arg10[%c0_20, %c0_21] : memref<128x128xf32, #tpu.memory_space<vmem>>, vector<128x128xf32>
    tpu.vector_store %arg10[%c0_20, %c0_21], %17 {strides = array<i32>} : memref<128x128xf32, #tpu.memory_space<vmem>>, vector<128x128xf32>,
    %c0_22 = arith.constant 0 : index
    %c0_23 = arith.constant 0 : index
    %32 = vector.load %arg11[%c0_22, %c0_23] : memref<128x256xf32, #tpu.memory_space<vmem>>, vector<128x256xf32>
    tpu.vector_store %arg11[%c0_22, %c0_23], %30 {strides = array<i32>} : memref<128x256xf32, #tpu.memory_space<vmem>>, vector<128x256xf32>,
    return
  }
  func.func @transform_0(%arg0: i32) -> (i32, i32) {
    %c0_i32 = arith.constant 0 : i32
    %c0_i32_0 = arith.constant 0 : i32
    return %arg0, %c0_i32 : i32, i32
  }
  func.func @transform_1(%arg0: i32) -> (i32, i32) {
    %c0_i32 = arith.constant 0 : i32
    %c0_i32_0 = arith.constant 0 : i32
    %c0_i32_1 = arith.constant 0 : i32
    return %c0_i32, %c0_i32_0 : i32, i32
  }
  func.func @transform_2(%arg0: i32) -> (i32, i32) {
    %c0_i32 = arith.constant 0 : i32
    %c0_i32_0 = arith.constant 0 : i32
    %c0_i32_1 = arith.constant 0 : i32
    return %c0_i32, %c0_i32_0 : i32, i32
  }
  func.func @transform_3(%arg0: i32) -> (i32, i32) {
    %c0_i32 = arith.constant 0 : i32
    %c0_i32_0 = arith.constant 0 : i32
    %c0_i32_1 = arith.constant 0 : i32
    return %c0_i32, %c0_i32_0 : i32, i32
  }
  func.func @transform_4(%arg0: i32) -> (i32, i32) {
    %c0_i32 = arith.constant 0 : i32
    %c0_i32_0 = arith.constant 0 : i32
    %c0_i32_1 = arith.constant 0 : i32
    return %c0_i32, %c0_i32_0 : i32, i32
  }
  func.func @transform_5(%arg0: i32) -> (i32, i32) {
    %c0_i32 = arith.constant 0 : i32
    %c0_i32_0 = arith.constant 0 : i32
    %c0_i32_1 = arith.constant 0 : i32
    return %c0_i32, %c0_i32_0 : i32, i32
  }
  func.func @transform_6(%arg0: i32) -> (i32, i32) {
    %c0_i32 = arith.constant 0 : i32
    %c0_i32_0 = arith.constant 0 : i32
    %c0_i32_1 = arith.constant 0 : i32
    return %c0_i32, %c0_i32_0 : i32, i32
  }
  func.func @transform_7(%arg0: i32) -> i32 {
    %c0_i32 = arith.constant 0 : i32
    %c0_i32_0 = arith.constant 0 : i32
    return %c0_i32 : i32
  }
  func.func @transform_8(%arg0: i32) -> i32 {
    %c0_i32 = arith.constant 0 : i32
    %c0_i32_0 = arith.constant 0 : i32
    return %c0_i32 : i32
  }
  func.func @transform_9(%arg0: i32) -> (i32, i32) {
    %c0_i32 = arith.constant 0 : i32
    %c0_i32_0 = arith.constant 0 : i32
    return %arg0, %c0_i32 : i32, i32
  }
  func.func @transform_10(%arg0: i32) -> (i32, i32) {
    %c0_i32 = arith.constant 0 : i32
    %c0_i32_0 = arith.constant 0 : i32
    return %arg0, %c0_i32 : i32, i32
  }
}

</mosaic_0001>

<bundles_post_ra>
// kernel: tied_multi_autoencoder_forward.1
= control target key start
LH: loop header
LB: loop body
LE: loop exit
PB: predicated region body
PF: predicated region fallthrough
CT: control target
= control target key end

     0   :  { %s2169_s0 = inlined_call_operand.hbm [shape: f32[256,256], index: 0, kind: input, shape index: {}]   ;;  %s2170_s1 = inlined_call_operand.hbm [shape: f32[128,256], index: 1, kind: input, shape index: {}]   ;;  %s2171_s2 = inlined_call_operand.vmem [shape: f32[1,128], index: 2, kind: input, shape index: {}]   ;;  %s2172_s3 = inlined_call_operand.hbm [shape: f32[128,128], index: 3, kind: input, shape index: {}]   ;;  %s2173_s4 = inlined_call_operand.vmem [shape: f32[1,128], index: 4, kind: input, shape index: {}]   ;;  %s2174_s5 = inlined_call_operand.vmem [shape: f32[1,128], index: 5, kind: input, shape index: {}]   ;;  %s2175_s6 = inlined_call_operand.vmem [shape: f32[1,256], index: 6, kind: input, shape index: {}]   ;;  %s2176_s7 = inlined_call_operand.<no memory space> [shape: f32[1], index: 7, kind: input, shape index: {}]   ;;  %s2177_s8 = inlined_call_operand.<no memory space> [shape: f32[1], index: 8, kind: input, shape index: {}]   ;;  %s2178_s9 = inlined_call_operand.hbm [shape: f32[256,128], index: 9, kind: output, shape index: {0}]   ;;  %s2179_s10 = inlined_call_operand.hbm [shape: f32[256,256], index: 10, kind: output, shape index: {1}]  }
   0x1   :  { %2182 = sst [smem:[#allocation17_spill]] %s2170_s1 }
   0x2   :  { %2183 = sst [smem:[#allocation18_spill]] %s2172_s3 }
   0x3   :  { %16 = sst [smem:[#allocation2]] %s2176_s7 }
   0x4   :  { %17 = sst [smem:[#allocation3]] %s2177_s8 }
   0x5   :  { %18 = vsyncpa [#allocation5], 0 }
   0x6   :  { %20 = vsyncpa [#allocation5 + $0x1], 0 }
   0x7   :  { %21 = vsyncpa [#allocation8], 0 }
   0x8   :  { %22 = vsyncpa [#allocation6], 0 }
   0x9   :  { %24 = vsyncpa [#allocation6 + $0x1], 0 }
   0xa   :  { %25 = vsyncpa [#allocation12], 0 }
   0xb   :  { %27 = vsyncpa [#allocation12 + $0x1], 0  ;;  %s1639_s17 = smov 0   ;;  %s1641_s18 = smov 0  }
   0xc   :  { %s1643_s19 = smov 0   ;;  %s1645_s20 = smov 0  }
   0xd LB: > { %s1660_s7 = sadd.s32 4294967295, %s1566_s20   ;;  %s1230_s8 = sadd.s32 4294967294, %s1566_s20   ;;  %s1566_s20 = sphi %s1645_s20, %s2197_s20   ;;  %s1562_s19 = sphi %s1643_s19, %s2196_s19   ;;  %s1558_s18 = sphi %s1641_s18, %s2195_s18   ;;  %s1554_s17 = sphi %s1639_s17, %s2194_s17  }
   0xe   : > { %p53_p0 = scmp.ne.s32.totalorder %s1558_s18, %s1554_s17  ;;  %p54_p1 = scmp.eq.s32.totalorder %s1660_s7, 0 }
   0xf   : > { %p245_p2 = scmp.eq.s32.totalorder %s1660_s7, 1  ;;  %p251_p3 = scmp.eq.s32.totalorder %s1230_s8, 1 }
  0x10   : > { %p1669_p4 = por %p54_p1, %p53_p0  ;;  %p1231_p5 = scmp.ge.s32.totalorder %s1566_s20, 1 }
  0x11   : > { %p1674_p6 = por %p251_p3, %p53_p0  ;;  %p284_p7 = scmp.lt.s32.totalorder %s1566_s20, 3 }
  0x12   : > { %s2186_s1 = sld [smem:[#allocation17_spill]]  ;;  %s1568_s27 = smov [#allocation7]  }
  0x13   : > { %p1682_p8 = pnand %p1231_p5, %p284_p7  ;;  %s297_s28 = sshll.u32 %s1568_s27, 4  ;;  %s298_s28 = int_to_ptr.vmem [resolvable:$true] %s297_s28 }
  0x14   : > { %s2188_s3 = sld [smem:[#allocation18_spill]]  ;;  %s2180_s12 = smov 256  }
  0x15   : > { %p1305_p9 = pneg %p1682_p8  ;;  %s2181_s13 = smov 16  }
  0x16   : > { %s1571_s14 = smov [#allocation9]   ;;  %s1572_s16 = smov 128  }
  0x17   : > { %p1306_p10 = pnand %p1305_p9, %p54_p1  ;;  %s314_s15 = sshll.u32 %s1571_s14, 4  ;;  %s315_s15 = int_to_ptr.vmem [resolvable:$true] %s314_s15 }
  0x18   : > { %s295_s25 = sshll.u32 %s2186_s1, 4  ;;  %s1573_s8 = smov 8   ;;  %s296_s25 = int_to_ptr.hbm [resolvable:$true] %s295_s25 }
  0x19   : > { %1308 = dma.hbm_to_vmem [thread:$0]  (!%p1306_p10), %s296_s25, 4096, %s298_s28, [#allocation8], %s2180_s12, %s2180_s12, %s2181_s13  }
  0x1a   : > { %s312_s11 = sshll.u32 %s2188_s3, 4  ;;  %s1698_s23 = sadd.s32 1, %s1566_s20   ;;  %s313_s11 = int_to_ptr.hbm [resolvable:$true] %s312_s11 }
  0x1b   : > { %1311 = dma.hbm_to_vmem [thread:$0]  (!%p1306_p10), %s313_s11, 2048, %s315_s15, [#allocation8], %s1572_s16, %s1572_s16, %s1573_s8  }
  0x1c   : > { %s37_s24 = ssub.s32 %s1566_s20, %s1698_s23  ;;  %s40_s27 = sadd.s32 1, %s1562_s19 }
  0x1d   : > { %p38_p12 = scmp.eq.s32.totalorder %s37_s24, 0  ;;  %p47_p13 = scmp.ne.s32.totalorder %s1562_s19, %s1558_s18 }
  0x1e   : > { %p48_p0 = scmp.eq.s32.totalorder %s1566_s20, 0  ;;  %p1325_p7 = scmp.lt.s32.totalorder %s1566_s20, 2 }
  0x1f   : > { %s1707_s29 = scalar_select %p38_p12, %s1562_s19, %s40_s27  }
  0x20   : > { %p49_p3 = por %p48_p0, %p47_p13  ;;  %p1711_p5 = por %p245_p2, %p47_p13 }
  0x21   : > { %s343_s28 = sand.u32 1, %s1562_s19   ;;  %s1255_s11 = sshll.u32 %s1566_s20, 8 }
  0x22   : > { %s1235_s30 = sshll.u32 %s343_s28, 8  ;;  %s353_s16 = scalar_lea.hbm %s2169_s0, %s1255_s11 }
  0x23   : > { %s347_s8 = scalar_lea.vmem [#allocation4], %s1235_s30  ;;  %s354_s12 = sshll.u32 %s353_s16, 4  ;;  %s355_s12 = int_to_ptr.hbm [resolvable:$true] %s354_s12 }
  0x24   : > { %s356_s24 = sshll.u32 %s347_s8, 4  ;;  %p1721_p9 = pnand %p1325_p7, %p49_p3  ;;  %s357_s24 = int_to_ptr.vmem [resolvable:$true] %s356_s24 }
  0x25   : > { %s344_s13 = scalar_lea.sflag [#allocation5], %s343_s28  ;;  %s1434_s1 = sshra.s32 %s355_s12, 4  ;;  %s1435_s1 = int_to_ptr.hbm [resolvable:$true] %s1434_s1 }
  0x26   : > { %s1436_s3 = scalar_lea.hbm %s1435_s1, 256  ;;  %p1438_p10 = pneg %p1721_p9 }
  0x27   : > { %p1437_p2 = scmp.ne.s32.totalorder %s1435_s1, %s1436_s3  ;;  %s1441_s14 = scalar_lea.hbm %s2169_s0, 512 }
  0x28   : > { %p1442_p0 = scmp.lt.s32.totalorder %s1435_s1, %s2169_s0  ;;  %p1443_p3 = scmp.lt.s32.totalorder %s1441_s14, %s1436_s3 }
  0x29   : > { %p1439_p12 = pnand %p1438_p10, %p1437_p2 }
  0x2a   : > { %p1444_p7 = por %p1443_p3, %p1442_p0 }
  0x2b   : > { %p1440_p13 = pneg %p1439_p12 }
  0x2d   : > { %p1445_p11 = pnand %p1444_p7, %p1440_p13 }
  0x2f   : > { %1448 = shalt.err (!%p1445_p11)
}
  0x30   : > { %s2191_s28 = smov 16   ;;  %s2192_s8 = smov 256  }
  0x31   : > { %1315 = dma.hbm_to_vmem [thread:$0]  (!%p1721_p9), %s355_s12, 4096, %s357_s24, %s344_s13, %s2192_s8, %s2192_s8, %s2191_s28  }
  0x32   : > { %368 = sbr.rel (%p1682_p8) target bundleno = 854 (0x356), region = 56  ;;  %s1741_s11 = sand.u32 (!%p1682_p8), 1, %s1558_s18  }
  0x33   : > { %s1240_s1 = sshll.u32 (!%p1682_p8), %s1741_s11, 8  ;;  %s371_s3 = scalar_lea.sflag (!%p1682_p8), [#allocation5], %s1741_s11 }
  0x34   : > { %s1747_s30 = scalar_lea.vmem (!%p1682_p8), [#allocation4], %s1240_s1 }
  0x37   : > { %1537 = dma.done.wait (%p1669_p4), %s371_s3, 4096  }
  0x38   : > { %1539 = vsyncadd (%p1669_p4), %s371_s3, 4294963200 }
  0x39   : > { %1541 = dma.done.wait (%p54_p1), [#allocation8], 6144  }
  0x3a   : > { %1543 = vsyncadd (%p54_p1), [#allocation8], 4294961152  ;;  %v1757_v0 = vld [vmem:[#allocation7 + $0xf0] sm:$0xff]  ;;  %v1761_v1 = vld [vmem:[#allocation7 + $0xe0] sm:$0xff]  ;;  %s510_s21 = sld [smem:[#allocation2]]  ;;  %s1243_s13 = sshll.u32 %s1741_s11, 7 }
  0x3b   : > { %1259 = vmatpush.xpose.msra.mxu1 %v1757_v0  ;;  %516 = vmatpush.xpose.msra.mxu0 %v1757_v0  ;;  %v1765_v2 = vld [vmem:[#allocation7 + $0xd0] sm:$0xff]  ;;  %v1769_v3 = vld [vmem:[#allocation7 + $0xc0] sm:$0xff]  ;;  %v493_v16 = vld [vmem:[#allocation7 + $0xf8] sm:$0xff]  ;;  %s1972_s14 = scalar_lea.vmem [#allocation10], %s1243_s13  ;;  %s511_s15 = sld [smem:[#allocation3]] }
  0x3c   : > { %v1773_v4 = vld [vmem:[#allocation7 + $0xb0] sm:$0xff]  ;;  %v1777_v5 = vld [vmem:[#allocation7 + $0xa0] sm:$0xff]  ;;  %v491_v18 = vld [vmem:[#allocation7 + $0xe8] sm:$0xff]  ;;  %s1084_s13 = sshll.u32 %s1972_s14, 4  ;;  %s2057_s27 = scalar_lea.vmem [#allocation11], %s1240_s1  ;;  %s1085_s13 = int_to_ptr.vmem [resolvable:$true] %s1084_s13 }
  0x3d   : > { %v1781_v6 = vld [vmem:[#allocation7 + $0x90] sm:$0xff]  ;;  %v1785_v7 = vld [vmem:[#allocation7 + $0x80] sm:$0xff]  ;;  %v489_v19 = vld [vmem:[#allocation7 + $0xd8] sm:$0xff]  ;;  %s1484_s3 = scalar_lea.hbm %s2178_s9, 256 }
  0x3e   : > { %v1789_v8 = vld [vmem:[#allocation7 + $0x70] sm:$0xff]  ;;  %v1793_v9 = vld [vmem:[#allocation7 + $0x60] sm:$0xff]  ;;  %v487_v20 = vld [vmem:[#allocation7 + $0xc8] sm:$0xff] }
  0x3f   : > { %1260 = vmatpush.xpose.msra.mxu1 %v1761_v1  ;;  %517 = vmatpush.xpose.msra.mxu0 %v1761_v1  ;;  %v1797_v10 = vld [vmem:[#allocation7 + $0x50] sm:$0xff]  ;;  %v1801_v11 = vld [vmem:[#allocation7 + $0x40] sm:$0xff]  ;;  %v485_v22 = vld [vmem:[#allocation7 + $0xb8] sm:$0xff] }
  0x40   : > { %v1805_v12 = vld [vmem:[#allocation7 + $0x30] sm:$0xff]  ;;  %v1809_v13 = vld [vmem:[#allocation7 + $0x20] sm:$0xff]  ;;  %v483_v23 = vld [vmem:[#allocation7 + $0xa8] sm:$0xff] }
  0x41   : > { %v1813_v14 = vld [vmem:[#allocation7 + $0x10] sm:$0xff]  ;;  %v1817_v15 = vld [vmem:[#allocation7] sm:$0xff]  ;;  %v481_v24 = vld [vmem:[#allocation7 + $0x98] sm:$0xff] }
  0x42   : > { %v444_v17 = vld [vmem:[%s1747_s30 + $0x70] sm:$0xff]  ;;  %v446_v21 = vld [vmem:[%s1747_s30 + $0x80] sm:$0xff]  ;;  %v479_v25 = vld [vmem:[#allocation7 + $0x88] sm:$0xff] }
  0x43   : > { %1261 = vmatpush.xpose.msra.mxu1 %v1765_v2  ;;  %518 = vmatpush.xpose.msra.mxu0 %v1765_v2  ;;  %v448_v26 = vld [vmem:[%s1747_s30 + $0x90] sm:$0xff]  ;;  %v477_v27 = vld [vmem:[#allocation7 + $0x78] sm:$0xff]  ;;  %v475_v28 = vld [vmem:[#allocation7 + $0x68] sm:$0xff] }
  0x44   : > { %v473_v29 = vld [vmem:[#allocation7 + $0x58] sm:$0xff]  ;;  %v471_v30 = vld [vmem:[#allocation7 + $0x48] sm:$0xff]  ;;  %v450_v31 = vld [vmem:[%s1747_s30 + $0xa0] sm:$0xff] }
  0x45   : > { %v469_v32 = vld [vmem:[#allocation7 + $0x38] sm:$0xff]  ;;  %v467_v33 = vld [vmem:[#allocation7 + $0x28] sm:$0xff]  ;;  %v452_v35 = vld [vmem:[%s1747_s30 + $0xb0] sm:$0xff] }
  0x46   : > { %v465_v34 = vld [vmem:[#allocation7 + $0x18] sm:$0xff]  ;;  %v430_v36 = vld [vmem:[%s1747_s30] sm:$0xff]  ;;  %v463_v37 = vld [vmem:[#allocation7 + $0x8] sm:$0xff] }
  0x47   : > { %1262 = vmatpush.xpose.msra.mxu1 %v1769_v3  ;;  %519 = vmatpush.xpose.msra.mxu0 %v1769_v3  ;;  %v454_v38 = vld [vmem:[%s1747_s30 + $0xc0] sm:$0xff]  ;;  %v432_v39 = vld [vmem:[%s1747_s30 + $0x10] sm:$0xff]  ;;  %v431_v46 = vld [vmem:[%s1747_s30 + $0x8] sm:$0xff] }
  0x48   : > { %v456_v40 = vld [vmem:[%s1747_s30 + $0xd0] sm:$0xff]  ;;  %v434_v41 = vld [vmem:[%s1747_s30 + $0x20] sm:$0xff]  ;;  %v433_v48 = vld [vmem:[%s1747_s30 + $0x18] sm:$0xff] }
  0x49   : > { %v458_v42 = vld [vmem:[%s1747_s30 + $0xe0] sm:$0xff]  ;;  %v436_v43 = vld [vmem:[%s1747_s30 + $0x30] sm:$0xff]  ;;  %v435_v50 = vld [vmem:[%s1747_s30 + $0x28] sm:$0xff] }
  0x4a   : > { %v460_v44 = vld [vmem:[%s1747_s30 + $0xf0] sm:$0xff]  ;;  %v438_v45 = vld [vmem:[%s1747_s30 + $0x40] sm:$0xff]  ;;  %v437_v51 = vld [vmem:[%s1747_s30 + $0x38] sm:$0xff] }
  0x4b   : > { %1263 = vmatpush.xpose.msra.mxu1 %v1773_v4  ;;  %520 = vmatpush.xpose.msra.mxu0 %v1773_v4  ;;  %v440_v47 = vld [vmem:[%s1747_s30 + $0x50] sm:$0xff]  ;;  %v442_v49 = vld [vmem:[%s1747_s30 + $0x60] sm:$0xff]  ;;  %v439_v52 = vld [vmem:[%s1747_s30 + $0x48] sm:$0xff] }
  0x4c   : > { %v1842_v53 = vld [vmem:[#allocation9 + $0x78] sm:$0xff]  ;;  %v1847_v55 = vld [vmem:[#allocation9 + $0x70] sm:$0xff]  ;;  %v1850_v56 = vld [vmem:[#allocation9 + $0x68] sm:$0xff] }
  0x4d   : > { %699 = vmatpush.xpose.msra.mxu2 %v1842_v53  ;;  %1275 = vmatpush.msra.mxu3 %v1842_v53  ;;  %v441_v54 = vld [vmem:[%s1747_s30 + $0x58] sm:$0xff]  ;;  %v443_v57 = vld [vmem:[%s1747_s30 + $0x68] sm:$0xff]  ;;  %v1856_v58 = vld [vmem:[#allocation9 + $0x60] sm:$0xff] }
  0x4e   : > { %v1859_v59 = vld [vmem:[#allocation9 + $0x58] sm:$0xff]  ;;  %v504_v62 = vld [vmem:[#allocation9 + $0x50] sm:$0xff]  ;;  %v1867_v63 = vld [vmem:[#allocation9 + $0x48] sm:$0xff] }
  0x4f   : > { %1264 = vmatpush.xpose.msra.mxu1 %v1777_v5  ;;  %521 = vmatpush.xpose.msra.mxu0 %v1777_v5  ;;  %v445_v61 = vld [vmem:[%s1747_s30 + $0x78] sm:$0xff] }
  0x50   : > { %1276 = vmatpush.msra.mxu3 %v1847_v55 }
  0x51   : > { %700 = vmatpush.xpose.msra.mxu2 %v1847_v55 }
  0x52   : > { %1277 = vmatpush.msra.mxu3 %v1850_v56 }
  0x53   : > { %1265 = vmatpush.xpose.msra.mxu1 %v1781_v6  ;;  %522 = vmatpush.xpose.msra.mxu0 %v1781_v6 }
  0x54   : > { %1278 = vmatpush.msra.mxu3 %v1856_v58 }
  0x55   : > { %701 = vmatpush.xpose.msra.mxu2 %v1850_v56 }
  0x56   : > { %1279 = vmatpush.msra.mxu3 %v1859_v59 }
  0x57   : > { %1266 = vmatpush.xpose.msra.mxu1 %v1785_v7  ;;  %523 = vmatpush.xpose.msra.mxu0 %v1785_v7 }
  0x58   : > { %1280 = vmatpush.msra.mxu3 %v504_v62 }
  0x59   : > { %702 = vmatpush.xpose.msra.mxu2 %v1856_v58 }
  0x5a   : > { %1281 = vmatpush.msra.mxu3 %v1867_v63 }
  0x5b   : > { %1267 = vmatpush.xpose.msra.mxu1 %v1789_v8  ;;  %524 = vmatpush.xpose.msra.mxu0 %v1789_v8 }
  0x5d   : > { %703 = vmatpush.xpose.msra.mxu2 %v1859_v59 }
  0x5f   : > { %1268 = vmatpush.xpose.msra.mxu1 %v1793_v9  ;;  %525 = vmatpush.xpose.msra.mxu0 %v1793_v9 }
  0x61   : > { %704 = vmatpush.xpose.msra.mxu2 %v504_v62 }
  0x63   : > { %1269 = vmatpush.xpose.msra.mxu1 %v1797_v10  ;;  %526 = vmatpush.xpose.msra.mxu0 %v1797_v10 }
  0x65   : > { %705 = vmatpush.xpose.msra.mxu2 %v1867_v63 }
  0x67   : > { %1270 = vmatpush.xpose.msra.mxu1 %v1801_v11  ;;  %527 = vmatpush.xpose.msra.mxu0 %v1801_v11 }
  0x6b   : > { %1271 = vmatpush.xpose.msra.mxu1 %v1805_v12  ;;  %528 = vmatpush.xpose.msra.mxu0 %v1805_v12 }
  0x6f   : > { %1272 = vmatpush.xpose.msra.mxu1 %v1809_v13  ;;  %529 = vmatpush.xpose.msra.mxu0 %v1809_v13 }
  0x73   : > { %1273 = vmatpush.xpose.msra.mxu1 %v1813_v14  ;;  %530 = vmatpush.xpose.msra.mxu0 %v1813_v14 }
  0x77   : > { %1274 = vmatpush.xpose.msra.mxu1 %v1817_v15  ;;  %531 = vmatpush.xpose.msra.mxu0 %v1817_v15 }
  0x7a   : > { %553 = vmatmul.f32.vlgmr.msra.gmra.mxu1 %v444_v17  ;;  %532 = vmatmul.f32.vlgmr.msra.gmra.mxu0 %v430_v36  ;;  %v447_v17 = vld [vmem:[%s1747_s30 + $0x88] sm:$0xff]  ;;  %v457_v36 = vld [vmem:[%s1747_s30 + $0xd8] sm:$0xff] }
  0x7b   : > { %581 = vmatpush.xpose.msrb.mxu1 %v493_v16  ;;  %953 = vmatpush.msrb.mxu0 %v493_v16 }
  0x7d   : > { %954 = vmatpush.msrb.mxu0 %v491_v18 }
  0x7f   : > { %582 = vmatpush.xpose.msrb.mxu1 %v491_v18  ;;  %955 = vmatpush.msrb.mxu0 %v489_v19  ;;  %v502_v18 = vld [vmem:[#allocation9 + $0x40] sm:$0xff] }
  0x80   : > { %706 = vmatpush.xpose.msra.mxu2 %v502_v18  ;;  %1282 = vmatpush.msra.mxu3 %v502_v18 }
  0x81   : > { %956 = vmatpush.msrb.mxu0 %v487_v20 }
  0x82   : > { %556 = vmatmul.f32.gmra.mxu1 %v446_v21  ;;  %535 = vmatmul.f32.gmra.mxu0 %v432_v39  ;;  %v449_v21 = vld [vmem:[%s1747_s30 + $0x98] sm:$0xff] }
  0x83   : > { %583 = vmatpush.xpose.msrb.mxu1 %v489_v19  ;;  %957 = vmatpush.msrb.mxu0 %v485_v22  ;;  %v501_v19 = vld [vmem:[#allocation9 + $0x38] sm:$0xff] }
  0x84   : > { %1283 = vmatpush.msra.mxu3 %v501_v19  ;;  %707 = vmatpush.xpose.msra.mxu2 %v501_v19 }
  0x85   : > { %958 = vmatpush.msrb.mxu0 %v483_v23 }
  0x87   : > { %584 = vmatpush.xpose.msrb.mxu1 %v487_v20  ;;  %959 = vmatpush.msrb.mxu0 %v481_v24 }
  0x89   : > { %960 = vmatpush.msrb.mxu0 %v479_v25 }
  0x8a   : > { %559 = vmatmul.f32.gmra.mxu1 %v448_v26  ;;  %538 = vmatmul.f32.gmra.mxu0 %v434_v41  ;;  %v498_v26 = vld [vmem:[#allocation9 + $0x20] sm:$0xff] }
  0x8b   : > { %585 = vmatpush.xpose.msrb.mxu1 %v485_v22  ;;  %961 = vmatpush.msrb.mxu0 %v477_v27  ;;  %v500_v22 = vld [vmem:[#allocation9 + $0x30] sm:$0xff] }
  0x8c   : > { %708 = vmatpush.xpose.msra.mxu2 %v500_v22  ;;  %1284 = vmatpush.msra.mxu3 %v500_v22 }
  0x8d   : > { %962 = vmatpush.msrb.mxu0 %v475_v28 }
  0x8f   : > { %586 = vmatpush.xpose.msrb.mxu1 %v483_v23  ;;  %963 = vmatpush.msrb.mxu0 %v473_v29  ;;  %v499_v23 = vld [vmem:[#allocation9 + $0x28] sm:$0xff] }
  0x90   : > { %1285 = vmatpush.msra.mxu3 %v499_v23  ;;  %709 = vmatpush.xpose.msra.mxu2 %v499_v23 }
  0x91   : > { %964 = vmatpush.msrb.mxu0 %v471_v30 }
  0x92   : > { %562 = vmatmul.f32.gmra.mxu1 %v450_v31  ;;  %541 = vmatmul.f32.gmra.mxu0 %v436_v43  ;;  %v495_v31 = vld [vmem:[#allocation9 + $0x8] sm:$0xff] }
  0x93   : > { %587 = vmatpush.xpose.msrb.mxu1 %v481_v24  ;;  %965 = vmatpush.msrb.mxu0 %v469_v32 }
  0x94   : > { %710 = vmatpush.xpose.msra.mxu2 %v498_v26  ;;  %1286 = vmatpush.msra.mxu3 %v498_v26 }
  0x95   : > { %966 = vmatpush.msrb.mxu0 %v467_v33 }
  0x97   : > { %588 = vmatpush.xpose.msrb.mxu1 %v479_v25  ;;  %967 = vmatpush.msrb.mxu0 %v465_v34  ;;  %v451_v25 = vld [vmem:[%s1747_s30 + $0xa8] sm:$0xff] }
  0x99   : > { %968 = vmatpush.msrb.mxu0 %v463_v37 }
  0x9a   : > { %565 = vmatmul.f32.gmra.mxu1 %v452_v35  ;;  %544 = vmatmul.f32.gmra.mxu0 %v438_v45 }
  0x9b   : > { %589 = vmatpush.xpose.msrb.mxu1 %v477_v27  ;;  %v497_v27 = vld [vmem:[#allocation9 + $0x18] sm:$0xff] }
  0x9c   : > { %1287 = vmatpush.msra.mxu3 %v497_v27  ;;  %711 = vmatpush.xpose.msra.mxu2 %v497_v27 }
  0x9f   : > { %590 = vmatpush.xpose.msrb.mxu1 %v475_v28 }
  0xa2   : > { %568 = vmatmul.f32.gmra.mxu1 %v454_v38  ;;  %547 = vmatmul.f32.gmra.mxu0 %v440_v47 }
  0xa3   : > { %591 = vmatpush.xpose.msrb.mxu1 %v473_v29  ;;  %v453_v29 = vld [vmem:[%s1747_s30 + $0xb8] sm:$0xff] }
  0xa7   : > { %592 = vmatpush.xpose.msrb.mxu1 %v471_v30  ;;  %v496_v30 = vld [vmem:[#allocation9 + $0x10] sm:$0xff] }
  0xa8   : > { %712 = vmatpush.xpose.msra.mxu2 %v496_v30  ;;  %1288 = vmatpush.msra.mxu3 %v496_v30 }
  0xaa   : > { %571 = vmatmul.f32.gmra.mxu1 %v456_v40  ;;  %550 = vmatmul.f32.gmra.mxu0 %v442_v49 }
  0xab   : > { %593 = vmatpush.xpose.msrb.mxu1 %v469_v32  ;;  %1289 = vmatpush.msra.mxu3 %v495_v31 }
  0xac   : > { %713 = vmatpush.xpose.msra.mxu2 %v495_v31 }
  0xaf   : > { %594 = vmatpush.xpose.msrb.mxu1 %v467_v33  ;;  %v455_v33 = vld [vmem:[%s1747_s30 + $0xc8] sm:$0xff] }
  0xb2   : > { %574 = vmatmul.f32.gmra.mxu1 %v458_v42 }
  0xb3   : > { %595 = vmatpush.xpose.msrb.mxu1 %v465_v34  ;;  %v494_v34 = vld [vmem:[#allocation9] sm:$0xff] }
  0xb4   : > { %1290 = vmatpush.msra.mxu3 %v494_v34  ;;  %714 = vmatpush.xpose.msra.mxu2 %v494_v34 }
  0xb6   : > { %888 = vmatpush.msrb.mxu3 %v1757_v0 }
  0xb7   : > { %596 = vmatpush.xpose.msrb.mxu1 %v463_v37  ;;  %v459_v37 = vld [vmem:[%s1747_s30 + $0xe8] sm:$0xff] }
  0xb8   : > { %768 = vmatpush.msrb.mxu2 %v1842_v53  ;;  %889 = vmatpush.msrb.mxu3 %v1761_v1 }
  0xba   : > { %577 = vmatmul.f32.gmra.mxu1 %v460_v44  ;;  %769 = vmatpush.msrb.mxu2 %v1847_v55 }
  0xbb   : > { %890 = vmatpush.msrb.mxu3 %v1765_v2 }
  0xbc   : > { %770 = vmatpush.msrb.mxu2 %v1850_v56 }
  0xbd   : > { %891 = vmatpush.msrb.mxu3 %v1769_v3  ;;  %v461_v3 = vld [vmem:[%s1747_s30 + $0xf8] sm:$0xff]  ;;  %s1256_s30 = sshll.u32 %s1660_s7, 7 }
  0xbe   : > { %771 = vmatpush.msrb.mxu2 %v1856_v58  ;;  %s1083_s12 = scalar_lea.hbm %s2178_s9, %s1256_s30 }
  0xbf   : > { %892 = vmatpush.msrb.mxu3 %v1773_v4  ;;  %s1086_s24 = sshll.u32 %s1083_s12, 4  ;;  %s1087_s24 = int_to_ptr.hbm [resolvable:$true] %s1086_s24 }
  0xc0   : > { %772 = vmatpush.msrb.mxu2 %v1859_v59  ;;  %s1478_s16 = sshra.s32 %s1087_s24, 4  ;;  %s1479_s16 = int_to_ptr.hbm [resolvable:$true] %s1478_s16 }
  0xc1   : > { %893 = vmatpush.msrb.mxu3 %v1777_v5  ;;  %v1916_v5 = vld [vmem:[%s2171_s2] ss:$0 sm:$0xff]  ;;  %s1480_s28 = scalar_lea.hbm %s1479_s16, 128  ;;  %p1485_p11 = scmp.lt.s32.totalorder %s1479_s16, %s2178_s9 }
  0xc2   : > { %597 = vmatmul.f32.vlgmr.msrb.gmra.mxu1 %v431_v46  ;;  %773 = vmatpush.msrb.mxu2 %v504_v62  ;;  %p1481_p1 = scmp.ne.s32.totalorder %s1479_s16, %s1480_s28  ;;  %p1486_p9 = scmp.lt.s32.totalorder %s1484_s3, %s1480_s28 }
  0xc3   : > { %894 = vmatpush.msrb.mxu3 %v1781_v6 }
  0xc4   : > { %774 = vmatpush.msrb.mxu2 %v1867_v63  ;;  %p1482_p4 = pnand %p1481_p1, %p1711_p5  ;;  %p1487_p2 = por %p1486_p9, %p1485_p11 }
  0xc5   : > { %895 = vmatpush.msrb.mxu3 %v1785_v7 }
  0xc6   : > { %775 = vmatpush.msrb.mxu2 %v502_v18  ;;  %p1483_p8 = pneg %p1482_p4 }
  0xc7   : > { %896 = vmatpush.msrb.mxu3 %v1789_v8  ;;  %v1921_v8 = vstv %s510_s21 }
  0xc8   : > { %776 = vmatpush.msrb.mxu2 %v501_v19  ;;  %p1488_p10 = pnand %p1487_p2, %p1483_p8 }
  0xc9   : > { %897 = vmatpush.msrb.mxu3 %v1793_v9 }
  0xca   : > { %600 = vmatmul.f32.gmra.mxu1 %v433_v48  ;;  %777 = vmatpush.msrb.mxu2 %v500_v22 }
  0xcb   : > { %898 = vmatpush.msrb.mxu3 %v1797_v10 }
  0xcc   : > { %778 = vmatpush.msrb.mxu2 %v499_v23 }
  0xcd   : > { %899 = vmatpush.msrb.mxu3 %v1801_v11 }
  0xce   : > { %779 = vmatpush.msrb.mxu2 %v498_v26 }
  0xcf   : > { %900 = vmatpush.msrb.mxu3 %v1805_v12 }
  0xd0   : > { %780 = vmatpush.msrb.mxu2 %v497_v27 }
  0xd1   : > { %901 = vmatpush.msrb.mxu3 %v1809_v13 }
  0xd2   : > { %603 = vmatmul.f32.gmra.mxu1 %v435_v50  ;;  %781 = vmatpush.msrb.mxu2 %v496_v30 }
  0xd3   : > { %902 = vmatpush.msrb.mxu3 %v1813_v14 }
  0xd4   : > { %782 = vmatpush.msrb.mxu2 %v495_v31 }
  0xd5   : > { %903 = vmatpush.msrb.mxu3 %v1817_v15 }
  0xd6   : > { %783 = vmatpush.msrb.mxu2 %v494_v34 }
  0xda   : > { %606 = vmatmul.f32.gmra.mxu1 %v437_v51 }
  0xe2   : > { %609 = vmatmul.f32.gmra.mxu1 %v439_v52 }
  0xea   : > { %612 = vmatmul.f32.gmra.mxu1 %v441_v54 }
  0xf2   : > { %615 = vmatmul.f32.gmra.mxu1 %v443_v57 }
  0xf7   : > { %v1864_v60 = vpop.f32.mrf.mxu1  ;;  %v533_v0 = vpop.f32.mrf.mxu0 }
  0xf8   : > { %v534_v6 = vadd.f32 %v1916_v5, %v533_v0 }
  0xfa   : > { %618 = vmatmul.f32.gmra.mxu1 %v445_v61 }
  0xff   : > { %v1871_v16 = vpop.f32.mrf.mxu1  ;;  %v536_v4 = vpop.f32.mrf.mxu0 }
 0x100   : > { %v537_v12 = vadd.f32 %v1916_v5, %v536_v4  ;;  %v558_v31 = vadd.f32 %v1916_v5, %v1871_v16 }
 0x102   : > { %621 = vmatmul.f32.gmra.mxu1 %v447_v17 }
 0x107   : > { %v1874_v20 = vpop.f32.mrf.mxu1  ;;  %v539_v10 = vpop.f32.mrf.mxu0 }
 0x108   : > { %v540_v14 = vadd.f32 %v1916_v5, %v539_v10 }
 0x10a   : > { %624 = vmatmul.f32.gmra.mxu1 %v449_v21 }
 0x10f   : > { %v1877_v24 = vpop.f32.mrf.mxu1  ;;  %v542_v41 = vpop.f32.mrf.mxu0 }
 0x110   : > { %v543_v45 = vadd.f32 %v1916_v5, %v542_v41  ;;  %v564_v16 = vadd.f32 %v1916_v5, %v1877_v24 }
 0x112   : > { %627 = vmatmul.f32.gmra.mxu1 %v451_v25  ;;  %v555_v25 = vadd.f32 %v1916_v5, %v1864_v60  ;;  %v561_v60 = vadd.f32 %v1916_v5, %v1874_v20 }
 0x117   : > { %v1880_v28 = vpop.f32.mrf.mxu1  ;;  %v545_v47 = vpop.f32.mrf.mxu0 }
 0x118   : > { %v546_v51 = vadd.f32 %v1916_v5, %v545_v47  ;;  %v567_v20 = vadd.f32 %v1916_v5, %v1880_v28 }
 0x11a   : > { %630 = vmatmul.f32.gmra.mxu1 %v453_v29 }
 0x11f   : > { %v1883_v32 = vpop.f32.mrf.mxu1  ;;  %v548_v54 = vpop.f32.mrf.mxu0 }
 0x120   : > { %v549_v57 = vadd.f32 %v1916_v5, %v548_v54  ;;  %v570_v24 = vadd.f32 %v1916_v5, %v1883_v32 }
 0x122   : > { %633 = vmatmul.f32.gmra.mxu1 %v455_v33 }
 0x127   : > { %v1890_v35 = vpop.f32.mrf.mxu1  ;;  %v551_v62 = vpop.f32.mrf.mxu0 }
 0x128   : > { %v552_v17 = vadd.f32 %v1916_v5, %v551_v62  ;;  %v573_v28 = vadd.f32 %v1916_v5, %v1890_v35 }
 0x12a   : > { %636 = vmatmul.f32.gmra.mxu1 %v457_v36 }
 0x12f   : > { %v1900_v1 = vpop.f32.mrf.mxu1 }
 0x130   : > { %v576_v32 = vadd.f32 %v1916_v5, %v1900_v1  ;;  %v1969_v1 = vld [vmem:[%s2173_s4] ss:$0 sm:$0xff] }
 0x132   : > { %639 = vmatmul.f32.gmra.mxu1 %v459_v37 }
 0x137   : > { %v1908_v2 = vpop.f32.mrf.mxu1 }
 0x138   : > { %v579_v35 = vadd.f32 %v1916_v5, %v1908_v2 }
 0x13a   : > { %642 = vmatmul.f32.gmra.mxu1 %v461_v3 }
 0x13f   : > { %v598_v7 = vpop.f32.mrf.mxu1 }
 0x140   : > { %v599_v9 = vadd.f32 %v598_v7, %v534_v6 }
 0x142   : > { %vm646_vm0 = vcmp.gt.f32.partialorder %v599_v9, 0.0  ;;  %v663_v11 = vmul.f32 %v1921_v8, %v599_v9 }
 0x144   : > { %v679_v38 = vsel %vm646_vm0, %v599_v9, %v663_v11 }
 0x145   : > { %715 = vmatmul.f32.vlgmr.msra.gmra.mxu2 %v679_v38 }
 0x147   : > { %v601_v39 = vpop.f32.mrf.mxu1 }
 0x148   : > { %v602_v13 = vadd.f32 %v601_v39, %v537_v12 }
 0x14a   : > { %vm647_vm1 = vcmp.gt.f32.partialorder %v602_v13, 0.0  ;;  %v664_v40 = vmul.f32 %v1921_v8, %v602_v13 }
 0x14c   : > { %v680_v42 = vsel %vm647_vm1, %v602_v13, %v664_v40 }
 0x14d   : > { %718 = vmatmul.f32.gmra.mxu2 %v680_v42 }
 0x14f   : > { %v604_v43 = vpop.f32.mrf.mxu1 }
 0x150   : > { %v605_v44 = vadd.f32 %v604_v43, %v540_v14 }
 0x152   : > { %vm648_vm2 = vcmp.gt.f32.partialorder %v605_v44, 0.0  ;;  %v665_v15 = vmul.f32 %v1921_v8, %v605_v44 }
 0x154   : > { %v681_v46 = vsel %vm648_vm2, %v605_v44, %v665_v15 }
 0x155   : > { %721 = vmatmul.f32.gmra.mxu2 %v681_v46 }
 0x157   : > { %v607_v48 = vpop.f32.mrf.mxu1 }
 0x158   : > { %v608_v49 = vadd.f32 %v607_v48, %v543_v45 }
 0x15a   : > { %vm649_vm3 = vcmp.gt.f32.partialorder %v608_v49, 0.0  ;;  %v666_v50 = vmul.f32 %v1921_v8, %v608_v49 }
 0x15c   : > { %v682_v52 = vsel %vm649_vm3, %v608_v49, %v666_v50 }
 0x15d   : > { %724 = vmatmul.f32.gmra.mxu2 %v682_v52 }
 0x15f   : > { %v610_v53 = vpop.f32.mrf.mxu1 }
 0x160   : > { %v611_v55 = vadd.f32 %v610_v53, %v546_v51 }
 0x162   : > { %vm650_vm4 = vcmp.gt.f32.partialorder %v611_v55, 0.0  ;;  %v667_v56 = vmul.f32 %v1921_v8, %v611_v55 }
 0x164   : > { %v683_v58 = vsel %vm650_vm4, %v611_v55, %v667_v56 }
 0x165   : > { %727 = vmatmul.f32.gmra.mxu2 %v683_v58 }
 0x167   : > { %v613_v59 = vpop.f32.mrf.mxu1 }
 0x168   : > { %v614_v61 = vadd.f32 %v613_v59, %v549_v57 }
 0x16a   : > { %vm651_vm5 = vcmp.gt.f32.partialorder %v614_v61, 0.0  ;;  %v668_v63 = vmul.f32 %v1921_v8, %v614_v61 }
 0x16c   : > { %v684_v18 = vsel %vm651_vm5, %v614_v61, %v668_v63 }
 0x16d   : > { %730 = vmatmul.f32.gmra.mxu2 %v684_v18 }
 0x16f   : > { %v616_v19 = vpop.f32.mrf.mxu1 }
 0x170   : > { %v617_v21 = vadd.f32 %v616_v19, %v552_v17 }
 0x172   : > { %vm652_vm6 = vcmp.gt.f32.partialorder %v617_v21, 0.0  ;;  %v669_v22 = vmul.f32 %v1921_v8, %v617_v21 }
 0x174   : > { %v685_v23 = vsel %vm652_vm6, %v617_v21, %v669_v22 }
 0x175   : > { %733 = vmatmul.f32.gmra.mxu2 %v685_v23 }
 0x177   : > { %v619_v26 = vpop.f32.mrf.mxu1 }
 0x178   : > { %v620_v27 = vadd.f32 %v619_v26, %v555_v25 }
 0x17a   : > { %vm653_vm7 = vcmp.gt.f32.partialorder %v620_v27, 0.0  ;;  %v670_v29 = vmul.f32 %v1921_v8, %v620_v27 }
 0x17c   : > { %v686_v30 = vsel %vm653_vm7, %v620_v27, %v670_v29 }
 0x17d   : > { %736 = vmatmul.f32.gmra.mxu2 %v686_v30 }
 0x17f   : > { %v622_v33 = vpop.f32.mrf.mxu1 }
 0x180   : > { %v623_v34 = vadd.f32 %v622_v33, %v558_v31 }
 0x182   : > { %vm654_vm8 = vcmp.gt.f32.partialorder %v623_v34, 0.0  ;;  %v671_v36 = vmul.f32 %v1921_v8, %v623_v34 }
 0x184   : > { %v687_v0 = vsel %vm654_vm8, %v623_v34, %v671_v36 }
 0x185   : > { %739 = vmatmul.f32.gmra.mxu2 %v687_v0 }
 0x187   : > { %v625_v37 = vpop.f32.mrf.mxu1 }
 0x188   : > { %v626_v3 = vadd.f32 %v625_v37, %v561_v60 }
 0x18a   : > { %vm655_vm9 = vcmp.gt.f32.partialorder %v626_v3, 0.0  ;;  %v672_v4 = vmul.f32 %v1921_v8, %v626_v3 }
 0x18c   : > { %v688_v6 = vsel %vm655_vm9, %v626_v3, %v672_v4 }
 0x18d   : > { %742 = vmatmul.f32.gmra.mxu2 %v688_v6  ;;  %v2008_v6 = vld [vmem:[%s2174_s5] ss:$0 sm:$0xff] }
 0x18f   : > { %v628_v7 = vpop.f32.mrf.mxu1 }
 0x190   : > { %v629_v9 = vadd.f32 %v628_v7, %v564_v16  ;;  %v2010_v7 = vstv %s511_s15  ;;  %s1067_s15 = scalar_lea.sflag [#allocation6], %s1741_s11 }
 0x192   : > { %vm656_vm10 = vcmp.gt.f32.partialorder %v629_v9, 0.0  ;;  %v673_v10 = vmul.f32 %v1921_v8, %v629_v9 }
 0x194   : > { %v689_v11 = vsel %vm656_vm10, %v629_v9, %v673_v10 }
 0x195   : > { %745 = vmatmul.f32.gmra.mxu2 %v689_v11 }
 0x197   : > { %v631_v12 = vpop.f32.mrf.mxu1 }
 0x198   : > { %v632_v38 = vadd.f32 %v631_v12, %v567_v20 }
 0x19a   : > { %vm657_vm11 = vcmp.gt.f32.partialorder %v632_v38, 0.0  ;;  %v674_v39 = vmul.f32 %v1921_v8, %v632_v38 }
 0x19c   : > { %v690_v13 = vsel %vm657_vm11, %v632_v38, %v674_v39 }
 0x19d   : > { %748 = vmatmul.f32.gmra.mxu2 %v690_v13 }
 0x19f   : > { %v634_v40 = vpop.f32.mrf.mxu1 }
 0x1a0   : > { %v635_v41 = vadd.f32 %v634_v40, %v570_v24 }
 0x1a2   : > { %vm658_vm12 = vcmp.gt.f32.partialorder %v635_v41, 0.0  ;;  %v675_v14 = vmul.f32 %v1921_v8, %v635_v41 }
 0x1a4   : > { %v691_v42 = vsel %vm658_vm12, %v635_v41, %v675_v14 }
 0x1a5   : > { %751 = vmatmul.f32.gmra.mxu2 %v691_v42 }
 0x1a7   : > { %v637_v43 = vpop.f32.mrf.mxu1 }
 0x1a8   : > { %v638_v44 = vadd.f32 %v637_v43, %v573_v28 }
 0x1aa   : > { %vm659_vm13 = vcmp.gt.f32.partialorder %v638_v44, 0.0  ;;  %v676_v15 = vmul.f32 %v1921_v8, %v638_v44 }
 0x1ac   : > { %v692_v45 = vsel %vm659_vm13, %v638_v44, %v676_v15 }
 0x1ad   : > { %754 = vmatmul.f32.gmra.mxu2 %v692_v45 }
 0x1af   : > { %v640_v46 = vpop.f32.mrf.mxu1 }
 0x1b0   : > { %v641_v47 = vadd.f32 %v640_v46, %v576_v32 }
 0x1b2   : > { %vm660_vm14 = vcmp.gt.f32.partialorder %v641_v47, 0.0  ;;  %v677_v48 = vmul.f32 %v1921_v8, %v641_v47 }
 0x1b4   : > { %v693_v49 = vsel %vm660_vm14, %v641_v47, %v677_v48 }
 0x1b5   : > { %757 = vmatmul.f32.gmra.mxu2 %v693_v49 }
 0x1b7   : > { %v643_v50 = vpop.f32.mrf.mxu1 }
 0x1b8   : > { %v644_v51 = vadd.f32 %v643_v50, %v579_v35 }
 0x1ba   : > { %vm661_vm15 = vcmp.gt.f32.partialorder %v644_v51, 0.0  ;;  %v678_v52 = vmul.f32 %v1921_v8, %v644_v51 }
 0x1bc   : > { %v694_v53 = vsel %vm661_vm15, %v644_v51, %v678_v52 }
 0x1bd   : > { %760 = vmatmul.f32.gmra.mxu2 %v694_v53 }
 0x1c8   : > { %v716_v54 = vpop.f32.mrf.mxu2 }
 0x1c9   : > { %v717_v55 = vadd.f32 %v1969_v1, %v716_v54 }
 0x1cb   : > { %1018 = vst [vmem:[%s1972_s14] sm:$0xff] %v717_v55  ;;  %784 = vmatmul.f32.vlgmr.msrb.gmra.mxu2 %v717_v55 }
 0x1d0   : > { %v719_v2 = vpop.f32.mrf.mxu2 }
 0x1d1   : > { %v720_v5 = vadd.f32 %v1969_v1, %v719_v2 }
 0x1d3   : > { %1019 = vst [vmem:[%s1972_s14 + $0x8] sm:$0xff] %v720_v5  ;;  %787 = vmatmul.f32.gmra.mxu2 %v720_v5 }
 0x1d8   : > { %v722_v8 = vpop.f32.mrf.mxu2 }
 0x1d9   : > { %v723_v56 = vadd.f32 %v1969_v1, %v722_v8 }
 0x1db   : > { %1020 = vst [vmem:[%s1972_s14 + $0x10] sm:$0xff] %v723_v56  ;;  %790 = vmatmul.f32.gmra.mxu2 %v723_v56 }
 0x1e0   : > { %v725_v57 = vpop.f32.mrf.mxu2 }
 0x1e1   : > { %v726_v58 = vadd.f32 %v1969_v1, %v725_v57 }
 0x1e3   : > { %1021 = vst [vmem:[%s1972_s14 + $0x18] sm:$0xff] %v726_v58  ;;  %793 = vmatmul.f32.gmra.mxu2 %v726_v58 }
 0x1e8   : > { %v728_v59 = vpop.f32.mrf.mxu2 }
 0x1e9   : > { %v729_v61 = vadd.f32 %v1969_v1, %v728_v59 }
 0x1eb   : > { %1022 = vst [vmem:[%s1972_s14 + $0x20] sm:$0xff] %v729_v61  ;;  %796 = vmatmul.f32.gmra.mxu2 %v729_v61 }
 0x1f0   : > { %v731_v62 = vpop.f32.mrf.mxu2 }
 0x1f1   : > { %v732_v63 = vadd.f32 %v1969_v1, %v731_v62 }
 0x1f3   : > { %1023 = vst [vmem:[%s1972_s14 + $0x28] sm:$0xff] %v732_v63  ;;  %799 = vmatmul.f32.vlgmr.msra.gmra.mxu3 %v732_v63 }
 0x1f8   : > { %v734_v17 = vpop.f32.mrf.mxu2 }
 0x1f9   : > { %v735_v18 = vadd.f32 %v1969_v1, %v734_v17 }
 0x1fb   : > { %1024 = vst [vmem:[%s1972_s14 + $0x30] sm:$0xff] %v735_v18  ;;  %802 = vmatmul.f32.gmra.mxu3 %v735_v18 }
 0x200   : > { %v737_v19 = vpop.f32.mrf.mxu2 }
 0x201   : > { %v738_v21 = vadd.f32 %v1969_v1, %v737_v19 }
 0x203   : > { %1025 = vst [vmem:[%s1972_s14 + $0x38] sm:$0xff] %v738_v21  ;;  %805 = vmatmul.f32.gmra.mxu3 %v738_v21 }
 0x208   : > { %v740_v22 = vpop.f32.mrf.mxu2 }
 0x209   : > { %v741_v23 = vadd.f32 %v1969_v1, %v740_v22 }
 0x20b   : > { %1026 = vst [vmem:[%s1972_s14 + $0x40] sm:$0xff] %v741_v23  ;;  %808 = vmatmul.f32.gmra.mxu3 %v741_v23 }
 0x210   : > { %v743_v25 = vpop.f32.mrf.mxu2 }
 0x211   : > { %v744_v26 = vadd.f32 %v1969_v1, %v743_v25 }
 0x213   : > { %1027 = vst [vmem:[%s1972_s14 + $0x48] sm:$0xff] %v744_v26  ;;  %811 = vmatmul.f32.gmra.mxu3 %v744_v26 }
 0x218   : > { %v746_v27 = vpop.f32.mrf.mxu2 }
 0x219   : > { %v747_v29 = vadd.f32 %v1969_v1, %v746_v27 }
 0x21b   : > { %1028 = vst [vmem:[%s1972_s14 + $0x50] sm:$0xff] %v747_v29  ;;  %814 = vmatmul.f32.gmra.mxu3 %v747_v29 }
 0x220   : > { %v749_v30 = vpop.f32.mrf.mxu2 }
 0x221   : > { %v750_v31 = vadd.f32 %v1969_v1, %v749_v30 }
 0x223   : > { %1029 = vst [vmem:[%s1972_s14 + $0x58] sm:$0xff] %v750_v31  ;;  %817 = vmatmul.f32.gmra.mxu3 %v750_v31 }
 0x228   : > { %v752_v33 = vpop.f32.mrf.mxu2 }
 0x229   : > { %v753_v34 = vadd.f32 %v1969_v1, %v752_v33 }
 0x22b   : > { %1030 = vst [vmem:[%s1972_s14 + $0x60] sm:$0xff] %v753_v34  ;;  %820 = vmatmul.f32.gmra.mxu3 %v753_v34 }
 0x230   : > { %v755_v36 = vpop.f32.mrf.mxu2 }
 0x231   : > { %v756_v0 = vadd.f32 %v1969_v1, %v755_v36 }
 0x233   : > { %1031 = vst [vmem:[%s1972_s14 + $0x68] sm:$0xff] %v756_v0  ;;  %823 = vmatmul.f32.gmra.mxu3 %v756_v0 }
 0x238   : > { %v758_v60 = vpop.f32.mrf.mxu2 }
 0x239   : > { %v759_v37 = vadd.f32 %v1969_v1, %v758_v60 }
 0x23b   : > { %1032 = vst [vmem:[%s1972_s14 + $0x70] sm:$0xff] %v759_v37  ;;  %826 = vmatmul.f32.gmra.mxu3 %v759_v37 }
 0x240   : > { %v761_v3 = vpop.f32.mrf.mxu2 }
 0x241   : > { %v762_v4 = vadd.f32 %v1969_v1, %v761_v3 }
 0x243   : > { %1033 = vst [vmem:[%s1972_s14 + $0x78] sm:$0xff] %v762_v4  ;;  %829 = vmatmul.f32.gmra.mxu3 %v762_v4 }
 0x24e   : > { %v785_v16 = vpop.f32.mrf.mxu2 }
 0x24f   : > { %v786_v9 = vadd.f32 %v2008_v6, %v785_v16 }
 0x251   : > { %v850_v10 = vmul.f32 %v2010_v7, %v786_v9  ;;  %vm833_vm0 = vcmp.gt.f32.partialorder %v786_v9, 0.0 }
 0x253   : > { %v866_v11 = vsel %vm833_vm0, %v786_v9, %v850_v10  ;;  %v882_v10 = vld [vmem:[%s2175_s6] sm:$0x3] }
 0x254   : > { %904 = vmatmul.f32.vlgmr.msrb.gmra.mxu3 %v866_v11  ;;  %969 = vmatmul.f32.vlgmr.msrb.gmra.mxu0 %v866_v11  ;;  %v2047_v11 = vperm.slane %v882_v10, 1 }
 0x256   : > { %v788_v20 = vpop.f32.mrf.mxu2 }
 0x257   : > { %v789_v12 = vadd.f32 %v2008_v6, %v788_v20  ;;  %v2060_v20 = vperm.slane %v882_v10, 0 }
 0x259   : > { %vm834_vm1 = vcmp.gt.f32.partialorder %v789_v12, 0.0  ;;  %v851_v38 = vmul.f32 %v2010_v7, %v789_v12 }
 0x25b   : > { %v867_v39 = vsel %vm834_vm1, %v789_v12, %v851_v38 }
 0x25c   : > { %907 = vmatmul.f32.gmra.mxu3 %v867_v39  ;;  %972 = vmatmul.f32.gmra.mxu0 %v867_v39 }
 0x25e   : > { %v791_v13 = vpop.f32.mrf.mxu2 }
 0x25f   : > { %v792_v24 = vadd.f32 %v2008_v6, %v791_v13 }
 0x261   : > { %vm835_vm2 = vcmp.gt.f32.partialorder %v792_v24, 0.0  ;;  %v852_v40 = vmul.f32 %v2010_v7, %v792_v24 }
 0x263   : > { %v868_v41 = vsel %vm835_vm2, %v792_v24, %v852_v40 }
 0x264   : > { %910 = vmatmul.f32.gmra.mxu3 %v868_v41  ;;  %975 = vmatmul.f32.gmra.mxu0 %v868_v41 }
 0x266   : > { %v794_v14 = vpop.f32.mrf.mxu2 }
 0x267   : > { %v795_v42 = vadd.f32 %v2008_v6, %v794_v14 }
 0x269   : > { %vm836_vm3 = vcmp.gt.f32.partialorder %v795_v42, 0.0  ;;  %v853_v28 = vmul.f32 %v2010_v7, %v795_v42 }
 0x26b   : > { %v869_v43 = vsel %vm836_vm3, %v795_v42, %v853_v28 }
 0x26c   : > { %913 = vmatmul.f32.gmra.mxu3 %v869_v43  ;;  %978 = vmatmul.f32.gmra.mxu0 %v869_v43 }
 0x26e   : > { %v797_v44 = vpop.f32.mrf.mxu2 }
 0x26f   : > { %v798_v15 = vadd.f32 %v2008_v6, %v797_v44 }
 0x271   : > { %vm837_vm4 = vcmp.gt.f32.partialorder %v798_v15, 0.0  ;;  %v854_v45 = vmul.f32 %v2010_v7, %v798_v15 }
 0x273   : > { %v870_v32 = vsel %vm837_vm4, %v798_v15, %v854_v45 }
 0x274   : > { %916 = vmatmul.f32.gmra.mxu3 %v870_v32  ;;  %981 = vmatmul.f32.gmra.mxu0 %v870_v32 }
 0x276   : > { %v800_v46 = vpop.f32.mrf.mxu3 }
 0x277   : > { %v801_v47 = vadd.f32 %v2008_v6, %v800_v46 }
 0x279   : > { %vm838_vm5 = vcmp.gt.f32.partialorder %v801_v47, 0.0  ;;  %v855_v48 = vmul.f32 %v2010_v7, %v801_v47 }
 0x27b   : > { %v871_v49 = vsel %vm838_vm5, %v801_v47, %v855_v48 }
 0x27c   : > { %919 = vmatmul.f32.gmra.mxu3 %v871_v49  ;;  %984 = vmatmul.f32.gmra.mxu0 %v871_v49 }
 0x27e   : > { %v803_v35 = vpop.f32.mrf.mxu3 }
 0x27f   : > { %v804_v50 = vadd.f32 %v2008_v6, %v803_v35 }
 0x281   : > { %vm839_vm6 = vcmp.gt.f32.partialorder %v804_v50, 0.0  ;;  %v856_v51 = vmul.f32 %v2010_v7, %v804_v50 }
 0x283   : > { %v872_v52 = vsel %vm839_vm6, %v804_v50, %v856_v51 }
 0x284   : > { %922 = vmatmul.f32.gmra.mxu3 %v872_v52  ;;  %987 = vmatmul.f32.gmra.mxu0 %v872_v52 }
 0x286   : > { %v806_v53 = vpop.f32.mrf.mxu3 }
 0x287   : > { %v807_v1 = vadd.f32 %v2008_v6, %v806_v53 }
 0x289   : > { %vm840_vm7 = vcmp.gt.f32.partialorder %v807_v1, 0.0  ;;  %v857_v54 = vmul.f32 %v2010_v7, %v807_v1 }
 0x28b   : > { %v873_v55 = vsel %vm840_vm7, %v807_v1, %v857_v54 }
 0x28c   : > { %925 = vmatmul.f32.gmra.mxu3 %v873_v55  ;;  %990 = vmatmul.f32.gmra.mxu0 %v873_v55 }
 0x28e   : > { %v809_v2 = vpop.f32.mrf.mxu3 }
 0x28f   : > { %v810_v5 = vadd.f32 %v2008_v6, %v809_v2 }
 0x291   : > { %vm841_vm8 = vcmp.gt.f32.partialorder %v810_v5, 0.0  ;;  %v858_v8 = vmul.f32 %v2010_v7, %v810_v5 }
 0x293   : > { %v874_v56 = vsel %vm841_vm8, %v810_v5, %v858_v8 }
 0x294   : > { %928 = vmatmul.f32.gmra.mxu3 %v874_v56  ;;  %993 = vmatmul.f32.gmra.mxu0 %v874_v56 }
 0x296   : > { %v812_v57 = vpop.f32.mrf.mxu3 }
 0x297   : > { %v813_v58 = vadd.f32 %v2008_v6, %v812_v57 }
 0x299   : > { %vm842_vm9 = vcmp.gt.f32.partialorder %v813_v58, 0.0  ;;  %v859_v59 = vmul.f32 %v2010_v7, %v813_v58 }
 0x29b   : > { %v875_v61 = vsel %vm842_vm9, %v813_v58, %v859_v59 }
 0x29c   : > { %931 = vmatmul.f32.gmra.mxu3 %v875_v61  ;;  %996 = vmatmul.f32.gmra.mxu0 %v875_v61 }
 0x29e   : > { %v815_v62 = vpop.f32.mrf.mxu3 }
 0x29f   : > { %v816_v63 = vadd.f32 %v2008_v6, %v815_v62 }
 0x2a1   : > { %vm843_vm10 = vcmp.gt.f32.partialorder %v816_v63, 0.0  ;;  %v860_v17 = vmul.f32 %v2010_v7, %v816_v63 }
 0x2a3   : > { %v876_v18 = vsel %vm843_vm10, %v816_v63, %v860_v17 }
 0x2a4   : > { %934 = vmatmul.f32.gmra.mxu3 %v876_v18  ;;  %999 = vmatmul.f32.gmra.mxu0 %v876_v18 }
 0x2a6   : > { %v818_v19 = vpop.f32.mrf.mxu3 }
 0x2a7   : > { %v819_v21 = vadd.f32 %v2008_v6, %v818_v19 }
 0x2a9   : > { %vm844_vm11 = vcmp.gt.f32.partialorder %v819_v21, 0.0  ;;  %v861_v22 = vmul.f32 %v2010_v7, %v819_v21 }
 0x2ab   : > { %v877_v23 = vsel %vm844_vm11, %v819_v21, %v861_v22 }
 0x2ac   : > { %937 = vmatmul.f32.gmra.mxu3 %v877_v23  ;;  %1002 = vmatmul.f32.gmra.mxu0 %v877_v23 }
 0x2ae   : > { %v821_v25 = vpop.f32.mrf.mxu3 }
 0x2af   : > { %v822_v26 = vadd.f32 %v2008_v6, %v821_v25 }
 0x2b1   : > { %vm845_vm12 = vcmp.gt.f32.partialorder %v822_v26, 0.0  ;;  %v862_v27 = vmul.f32 %v2010_v7, %v822_v26 }
 0x2b3   : > { %v878_v29 = vsel %vm845_vm12, %v822_v26, %v862_v27 }
 0x2b4   : > { %940 = vmatmul.f32.gmra.mxu3 %v878_v29  ;;  %1005 = vmatmul.f32.gmra.mxu0 %v878_v29 }
 0x2b6   : > { %v824_v30 = vpop.f32.mrf.mxu3 }
 0x2b7   : > { %v825_v31 = vadd.f32 %v2008_v6, %v824_v30 }
 0x2b9   : > { %v863_v33 = vmul.f32 %v2010_v7, %v825_v31  ;;  %vm846_vm13 = vcmp.gt.f32.partialorder %v825_v31, 0.0 }
 0x2bb   : > { %v879_v34 = vsel %vm846_vm13, %v825_v31, %v863_v33 }
 0x2bc   : > { %943 = vmatmul.f32.gmra.mxu3 %v879_v34  ;;  %1008 = vmatmul.f32.gmra.mxu0 %v879_v34 }
 0x2be   : > { %v827_v36 = vpop.f32.mrf.mxu3 }
 0x2bf   : > { %v828_v0 = vadd.f32 %v2008_v6, %v827_v36 }
 0x2c1   : > { %v864_v60 = vmul.f32 %v2010_v7, %v828_v0  ;;  %vm847_vm14 = vcmp.gt.f32.partialorder %v828_v0, 0.0 }
 0x2c3   : > { %v880_v37 = vsel %vm847_vm14, %v828_v0, %v864_v60 }
 0x2c4   : > { %946 = vmatmul.f32.gmra.mxu3 %v880_v37  ;;  %1011 = vmatmul.f32.gmra.mxu0 %v880_v37 }
 0x2c6   : > { %v830_v3 = vpop.f32.mrf.mxu3 }
 0x2c7   : > { %v831_v4 = vadd.f32 %v2008_v6, %v830_v3 }
 0x2c9   : > { %v865_v16 = vmul.f32 %v2010_v7, %v831_v4  ;;  %vm848_vm15 = vcmp.gt.f32.partialorder %v831_v4, 0.0 }
 0x2cb   : > { %v881_v9 = vsel %vm848_vm15, %v831_v4, %v865_v16 }
 0x2cc   : > { %949 = vmatmul.f32.gmra.mxu3 %v881_v9  ;;  %1014 = vmatmul.f32.gmra.mxu0 %v881_v9 }
 0x2d1   : > { %v970_v6 = vpop.f32.mrf.mxu0 }
 0x2d2   : > { %v971_v7 = vadd.f32 %v970_v6, %v2047_v11 }
 0x2d4   : > { %1035 = vst [vmem:[%s2057_s27 + $0x8] sm:$0xff] %v971_v7 }
 0x2d5   : > { %1491 = shalt.err (!%p1488_p10)
}
 0x2d6   : > { %s1574_s1 = smov 128   ;;  %s1575_s26 = smov 8  }
 0x2d7   : > { %1301 = dma.vmem_to_hbm [thread:$0]  (%p1711_p5), %s1085_s13, 2048, %s1087_s24, %s1067_s15, %s1574_s1, %s1574_s1, %s1575_s26   ;;  %v905_v12 = vpop.f32.mrf.mxu3 }
 0x2d8   : > { %v906_v38 = vadd.f32 %v905_v12, %v2060_v20  ;;  %s1258_s12 = sshll.u32 %s1660_s7, 8  ;;  %s1102_s16 = sshll.u32 %s2057_s27, 4  ;;  %s1103_s16 = int_to_ptr.vmem [resolvable:$true] %s1102_s16 }
 0x2d9   : > { %v973_v39 = vpop.f32.mrf.mxu0  ;;  %s1101_s15 = scalar_lea.hbm %s2179_s10, %s1258_s12  ;;  %s1072_s7 = scalar_lea.sflag [#allocation12], %s1741_s11 }
 0x2da   : > { %1034 = vst [vmem:[%s2057_s27] sm:$0xff] %v906_v38  ;;  %v974_v13 = vadd.f32 %v973_v39, %v2047_v11  ;;  %s1104_s28 = sshll.u32 %s1101_s15, 4  ;;  %s1512_s21 = scalar_lea.hbm %s2179_s10, 512  ;;  %s1105_s28 = int_to_ptr.hbm [resolvable:$true] %s1104_s28 }
 0x2db   : > { %s1506_s14 = sshra.s32 %s1105_s28, 4  ;;  %s1507_s14 = int_to_ptr.hbm [resolvable:$true] %s1506_s14 }
 0x2dc   : > { %1037 = vst [vmem:[%s2057_s27 + $0x18] sm:$0xff] %v974_v13  ;;  %s1508_s8 = scalar_lea.hbm %s1507_s14, 256  ;;  %p1513_p3 = scmp.lt.s32.totalorder %s1507_s14, %s2179_s10 }
 0x2dd   : > { %p1509_p12 = scmp.ne.s32.totalorder %s1507_s14, %s1508_s8  ;;  %p1514_p7 = scmp.lt.s32.totalorder %s1512_s21, %s1508_s8 }
 0x2df   : > { %v908_v24 = vpop.f32.mrf.mxu3  ;;  %p1510_p13 = pnand %p1509_p12, %p1711_p5  ;;  %p1515_p1 = por %p1514_p7, %p1513_p3 }
 0x2e0   : > { %v909_v40 = vadd.f32 %v908_v24, %v2060_v20 }
 0x2e1   : > { %v976_v41 = vpop.f32.mrf.mxu0  ;;  %p1511_p0 = pneg %p1510_p13 }
 0x2e2   : > { %1036 = vst [vmem:[%s2057_s27 + $0x10] sm:$0xff] %v909_v40  ;;  %v977_v14 = vadd.f32 %v976_v41, %v2047_v11 }
 0x2e3   : > { %p1516_p4 = pnand %p1515_p1, %p1511_p0 }
 0x2e4   : > { %1039 = vst [vmem:[%s2057_s27 + $0x28] sm:$0xff] %v977_v14 }
 0x2e7   : > { %v911_v42 = vpop.f32.mrf.mxu3 }
 0x2e8   : > { %v912_v28 = vadd.f32 %v911_v42, %v2060_v20 }
 0x2e9   : > { %v979_v43 = vpop.f32.mrf.mxu0 }
 0x2ea   : > { %1038 = vst [vmem:[%s2057_s27 + $0x20] sm:$0xff] %v912_v28  ;;  %v980_v44 = vadd.f32 %v979_v43, %v2047_v11 }
 0x2ec   : > { %1041 = vst [vmem:[%s2057_s27 + $0x38] sm:$0xff] %v980_v44 }
 0x2ef   : > { %v914_v15 = vpop.f32.mrf.mxu3 }
 0x2f0   : > { %v915_v45 = vadd.f32 %v914_v15, %v2060_v20 }
 0x2f1   : > { %v982_v32 = vpop.f32.mrf.mxu0 }
 0x2f2   : > { %1040 = vst [vmem:[%s2057_s27 + $0x30] sm:$0xff] %v915_v45  ;;  %v983_v46 = vadd.f32 %v982_v32, %v2047_v11 }
 0x2f4   : > { %1043 = vst [vmem:[%s2057_s27 + $0x48] sm:$0xff] %v983_v46 }
 0x2f7   : > { %v917_v47 = vpop.f32.mrf.mxu3 }
 0x2f8   : > { %v918_v48 = vadd.f32 %v917_v47, %v2060_v20 }
 0x2f9   : > { %v985_v49 = vpop.f32.mrf.mxu0 }
 0x2fa   : > { %1042 = vst [vmem:[%s2057_s27 + $0x40] sm:$0xff] %v918_v48  ;;  %v986_v35 = vadd.f32 %v985_v49, %v2047_v11 }
 0x2fc   : > { %1045 = vst [vmem:[%s2057_s27 + $0x58] sm:$0xff] %v986_v35 }
 0x2ff   : > { %v920_v50 = vpop.f32.mrf.mxu3 }
 0x300   : > { %v921_v51 = vadd.f32 %v920_v50, %v2060_v20 }
 0x301   : > { %v988_v52 = vpop.f32.mrf.mxu0 }
 0x302   : > { %1044 = vst [vmem:[%s2057_s27 + $0x50] sm:$0xff] %v921_v51  ;;  %v989_v53 = vadd.f32 %v988_v52, %v2047_v11 }
 0x304   : > { %1047 = vst [vmem:[%s2057_s27 + $0x68] sm:$0xff] %v989_v53 }
 0x307   : > { %v923_v1 = vpop.f32.mrf.mxu3 }
 0x308   : > { %v924_v54 = vadd.f32 %v923_v1, %v2060_v20 }
 0x309   : > { %v991_v55 = vpop.f32.mrf.mxu0 }
 0x30a   : > { %1046 = vst [vmem:[%s2057_s27 + $0x60] sm:$0xff] %v924_v54  ;;  %v992_v2 = vadd.f32 %v991_v55, %v2047_v11 }
 0x30c   : > { %1049 = vst [vmem:[%s2057_s27 + $0x78] sm:$0xff] %v992_v2 }
 0x30f   : > { %v926_v5 = vpop.f32.mrf.mxu3 }
 0x310   : > { %v927_v8 = vadd.f32 %v926_v5, %v2060_v20 }
 0x311   : > { %v994_v56 = vpop.f32.mrf.mxu0 }
 0x312   : > { %1048 = vst [vmem:[%s2057_s27 + $0x70] sm:$0xff] %v927_v8  ;;  %v995_v57 = vadd.f32 %v994_v56, %v2047_v11 }
 0x314   : > { %1051 = vst [vmem:[%s2057_s27 + $0x88] sm:$0xff] %v995_v57 }
 0x317   : > { %v929_v58 = vpop.f32.mrf.mxu3 }
 0x318   : > { %v930_v59 = vadd.f32 %v929_v58, %v2060_v20 }
 0x319   : > { %v997_v61 = vpop.f32.mrf.mxu0 }
 0x31a   : > { %1050 = vst [vmem:[%s2057_s27 + $0x80] sm:$0xff] %v930_v59  ;;  %v998_v62 = vadd.f32 %v997_v61, %v2047_v11 }
 0x31c   : > { %1053 = vst [vmem:[%s2057_s27 + $0x98] sm:$0xff] %v998_v62 }
 0x31f   : > { %v932_v63 = vpop.f32.mrf.mxu3 }
 0x320   : > { %v933_v17 = vadd.f32 %v932_v63, %v2060_v20 }
 0x321   : > { %v1000_v18 = vpop.f32.mrf.mxu0 }
 0x322   : > { %1052 = vst [vmem:[%s2057_s27 + $0x90] sm:$0xff] %v933_v17  ;;  %v1001_v19 = vadd.f32 %v1000_v18, %v2047_v11 }
 0x324   : > { %1055 = vst [vmem:[%s2057_s27 + $0xa8] sm:$0xff] %v1001_v19 }
 0x327   : > { %v935_v21 = vpop.f32.mrf.mxu3 }
 0x328   : > { %v936_v22 = vadd.f32 %v935_v21, %v2060_v20 }
 0x329   : > { %v1003_v23 = vpop.f32.mrf.mxu0 }
 0x32a   : > { %1054 = vst [vmem:[%s2057_s27 + $0xa0] sm:$0xff] %v936_v22  ;;  %v1004_v25 = vadd.f32 %v1003_v23, %v2047_v11 }
 0x32c   : > { %1057 = vst [vmem:[%s2057_s27 + $0xb8] sm:$0xff] %v1004_v25 }
 0x32f   : > { %v938_v26 = vpop.f32.mrf.mxu3 }
 0x330   : > { %v939_v27 = vadd.f32 %v938_v26, %v2060_v20 }
 0x331   : > { %v1006_v29 = vpop.f32.mrf.mxu0 }
 0x332   : > { %1056 = vst [vmem:[%s2057_s27 + $0xb0] sm:$0xff] %v939_v27  ;;  %v1007_v30 = vadd.f32 %v1006_v29, %v2047_v11 }
 0x334   : > { %1059 = vst [vmem:[%s2057_s27 + $0xc8] sm:$0xff] %v1007_v30 }
 0x337   : > { %v941_v31 = vpop.f32.mrf.mxu3 }
 0x338   : > { %v942_v33 = vadd.f32 %v941_v31, %v2060_v20 }
 0x339   : > { %v1009_v34 = vpop.f32.mrf.mxu0 }
 0x33a   : > { %1058 = vst [vmem:[%s2057_s27 + $0xc0] sm:$0xff] %v942_v33  ;;  %v1010_v36 = vadd.f32 %v1009_v34, %v2047_v11 }
 0x33c   : > { %1061 = vst [vmem:[%s2057_s27 + $0xd8] sm:$0xff] %v1010_v36 }
 0x33f   : > { %v944_v0 = vpop.f32.mrf.mxu3 }
 0x340   : > { %v945_v60 = vadd.f32 %v944_v0, %v2060_v20 }
 0x341   : > { %v1012_v37 = vpop.f32.mrf.mxu0 }
 0x342   : > { %1060 = vst [vmem:[%s2057_s27 + $0xd0] sm:$0xff] %v945_v60  ;;  %v1013_v3 = vadd.f32 %v1012_v37, %v2047_v11 }
 0x344   : > { %1063 = vst [vmem:[%s2057_s27 + $0xe8] sm:$0xff] %v1013_v3 }
 0x347   : > { %v947_v4 = vpop.f32.mrf.mxu3 }
 0x348   : > { %v948_v16 = vadd.f32 %v947_v4, %v2060_v20 }
 0x349   : > { %v1015_v9 = vpop.f32.mrf.mxu0 }
 0x34a   : > { %1062 = vst [vmem:[%s2057_s27 + $0xe0] sm:$0xff] %v948_v16  ;;  %v1016_v10 = vadd.f32 %v1015_v9, %v2047_v11 }
 0x34c   : > { %1065 = vst [vmem:[%s2057_s27 + $0xf8] sm:$0xff] %v1016_v10 }
 0x34f   : > { %v950_v6 = vpop.f32.mrf.mxu3 }
 0x350   : > { %v951_v7 = vadd.f32 %v950_v6, %v2060_v20 }
 0x352   : > { %1064 = vst [vmem:[%s2057_s27 + $0xf0] sm:$0xff] %v951_v7 }
 0x353   : > { %1519 = shalt.err (!%p1516_p4)
}
 0x354   : > { %s1576_s11 = smov 256   ;;  %s1577_s27 = smov 16  }
 0x355   : > { %1302 = dma.vmem_to_hbm [thread:$0]  (%p1711_p5), %s1103_s16, 4096, %s1105_s28, %s1072_s7, %s1576_s11, %s1576_s11, %s1577_s27  }
 0x356 PF: > { %s1119_s12 = sand.u32 1, %s1554_s17   ;;  %p2193_p8 = scmp.ge.s32.totalorder %s1566_s20, 2 }
 0x357   : > { %s1120_s13 = scalar_lea.sflag [#allocation6], %s1119_s12 }
 0x358   : > { %p1317_p11 = pnand %p2193_p8, %p1674_p6 }
 0x35a   : > { %p1318_p9 = pneg %p1317_p11 }
 0x35c   : > { %1545 = dma.done.wait (%p1318_p9), %s1120_s13, 2048  }
 0x35d   : > { %1547 = vsyncadd (%p1318_p9), %s1120_s13, 4294965248  ;;  %s1130_s24 = scalar_lea.sflag [#allocation12], %s1119_s12 }
 0x35e   : > { %1549 = dma.done.wait (%p1318_p9), %s1130_s24, 4096  }
 0x35f   : > { %1551 = vsyncadd (%p1318_p9), %s1130_s24, 4294963200  ;;  %p30_p5 = scmp.ge.s32.totalorder %s1698_s23, 4   ;;  %s2194_s17 = smov %s1558_s18 }
 0x360   : > { %s2195_s18 = smov %s1562_s19  ;;  %s2196_s19 = smov %s1707_s29 }
 0x361   : > { %s2197_s20 = smov %s1698_s23  ;;  %32 = sbr.rel (!%p30_p5) target bundleno = 13 (0xd), region = 126 }
 0x366   :  { %1136 = vsyncpa [#allocation5], 1 }
 0x367   :  { %1138 = vsyncpa [#allocation5 + $0x1], 1 }
 0x368   :  { %1139 = vsyncpa [#allocation8], 1 }
 0x369   :  { %1140 = vsyncpa [#allocation6], 1 }
 0x36a   :  { %1142 = vsyncpa [#allocation6 + $0x1], 1 }
 0x36b   :  { %1143 = vsyncpa [#allocation12], 1 }
 0x36c   :  { %1145 = vsyncpa [#allocation12 + $0x1], 1 }

</bundles_post_ra>
